<compile_context>
chip_gen: v6e
topology: v6e:2x2x1
jax: 0.10.0
libtpu: 0.0.40
codegen_flags: <defaults>
</compile_context>

<pallas_src>
import math

import jax
import jax.numpy as jnp
from jax.experimental import pallas as pl
from jax.experimental.pallas import tpu as pltpu  # noqa: F401  (TPU backend assumed)

D_MODEL = 32
NUM_HEADS = 4
HEAD_DIM = D_MODEL // NUM_HEADS
BATCH = 2
SEQ = 8
SCALE = 1.0 / math.sqrt(HEAD_DIM)


# ---------------------------------------------------------------------------
# Fused forward kernel: QKV projection -> RoPE -> attention -> out projection.
# Single grid point; everything (~30 KB) stays VMEM-resident for the call.
# ---------------------------------------------------------------------------
def _fused_attn_kernel(x_ref, wq_ref, wk_ref, wv_ref, bq_ref, bk_ref, bv_ref,
                       rot_ref, cos_ref, sin_ref, mask_ref, wo_ref, bo_ref,
                       o_ref):
    n = x_ref.shape[0]                       # N = B*S rows
    x = x_ref[...]                           # (N, D), lane-dense

    # --- QKV projection (Wqkv pre-split on host into three (D, D) matrices).
    q = jnp.dot(x, wq_ref[...], preferred_element_type=jnp.float32) + bq_ref[...]
    k = jnp.dot(x, wk_ref[...], preferred_element_type=jnp.float32) + bk_ref[...]
    v = jnp.dot(x, wv_ref[...], preferred_element_type=jnp.float32) + bv_ref[...]

    # --- Rotary embedding.  rotate_half is a fixed per-head signed permutation,
    # applied as one (N,D)@(D,D) matmul against a constant block-diagonal +/-1
    # matrix (MXU slot) instead of lane slices + concat (VPU shuffles).
    cos = cos_ref[...]
    sin = sin_ref[...]
    rot = rot_ref[...]
    q = q * cos + jnp.dot(q, rot, preferred_element_type=jnp.float32) * sin
    k = k * cos + jnp.dot(k, rot, preferred_element_type=jnp.float32) * sin

    # --- Head-batched attention.  Stack per-head (N, hd) slabs into (H, N, hd)
    # and contract all heads in one batched einsum.  Rows mix both batch
    # elements; cross-batch scores are killed by the additive mask below.
    def split_heads(t):
        return jnp.concatenate(
            [t[:, h * HEAD_DIM:(h + 1) * HEAD_DIM].reshape(1, n, HEAD_DIM)
             for h in range(NUM_HEADS)], axis=0)

    q3 = split_heads(q)                      # (H, N, hd)
    k3 = split_heads(k)
    v3 = split_heads(v)

    s = jnp.einsum('hqd,hkd->hqk', q3, k3,
                   preferred_element_type=jnp.float32) * SCALE   # (H, N, N)
    s = s + mask_ref[...]                    # additive mask: 0 / -1e30, (N, N)

    m = jnp.max(s, axis=-1, keepdims=True)
    e = jnp.exp(s - m)
    den = jnp.sum(e, axis=-1, keepdims=True)
    r = pl.reciprocal(den, approx=True)      # EUP slot
    r = r * (2.0 - den * r)                  # one Newton step -> ~full f32 accuracy
    p = e * r                                # softmax
    # TODO(synk): attention dropout (p=0.1) is identity in eval mode; not applied.

    ctx3 = jnp.einsum('hqk,hkd->hqd', p, v3,
                      preferred_element_type=jnp.float32)        # (H, N, hd)
    ctx = jnp.concatenate([ctx3[h] for h in range(NUM_HEADS)], axis=-1)  # (N, D)

    # --- Output projection; lane-dense (N, D) store.
    o_ref[...] = (jnp.dot(ctx, wo_ref[...], preferred_element_type=jnp.float32)
                  + bo_ref[...])


def fused_rotary_attention(x2, wq, wk, wv, bq, bk, bv, rot, cosf, sinf,
                           mask_add, wo, bo):
    n, d = x2.shape
    return pl.pallas_call(
        _fused_attn_kernel,
        out_shape=jax.ShapeDtypeStruct((n, d), jnp.float32),
    )(x2, wq, wk, wv, bq, bk, bv, rot, cosf, sinf, mask_add, wo, bo)


# ---------------------------------------------------------------------------
# Host-side constants (hoisted out of the per-call path).
# ---------------------------------------------------------------------------
def rope_tables(seqlen, dim):
    inv_freq = 1.0 / (10000.0 ** (jnp.arange(0, dim, 2, dtype=jnp.float32) / dim))
    t = jnp.arange(seqlen, dtype=jnp.float32)
    freqs = jnp.einsum("i,j->ij", t, inv_freq)              # (S, dim/2)
    emb = jnp.concatenate([freqs, freqs], axis=-1)          # (S, dim)
    return jnp.cos(emb), jnp.sin(emb)


def make_rope_constants(batch, seqlen, num_heads, head_dim):
    cos, sin = rope_tables(seqlen, head_dim)                # (S, hd)
    cosf = jnp.tile(cos, (batch, num_heads))                # (B*S, H*hd)
    sinf = jnp.tile(sin, (batch, num_heads))
    # rotate_half(x) = cat(-x2, x1) per head  ==>  x @ rh  with
    #   rh[j+hd/2, j] = -1 (j < hd/2),  rh[j-hd/2, j] = +1 (j >= hd/2)
    half = head_dim // 2
    rh = jnp.zeros((head_dim, head_dim), jnp.float32)
    rh = rh.at[jnp.arange(half) + half, jnp.arange(half)].set(-1.0)
    rh = rh.at[jnp.arange(half), jnp.arange(half) + half].set(1.0)
    rot = jnp.kron(jnp.eye(num_heads, dtype=jnp.float32), rh)   # (D, D) block-diag
    return cosf, sinf, rot


def make_additive_mask(attn_mask, batch):
    """(S,S) nonzero==masked  ->  (B*S, B*S) additive mask (0 / -1e30),
    with cross-batch blocks fully masked (heads/batches share one contraction)."""
    seqlen = attn_mask.shape[0]
    neg = jnp.float32(-1e30)
    intra = jnp.where(attn_mask != 0, neg, jnp.float32(0.0))
    eye_b = jnp.eye(batch, dtype=jnp.float32)
    cross = jnp.kron(1.0 - eye_b, jnp.full((seqlen, seqlen), neg, jnp.float32))
    return (jnp.kron(eye_b, intra) + cross).astype(jnp.float32)


# ---------------------------------------------------------------------------
# Forward wrapper
# ---------------------------------------------------------------------------
@jax.jit
def rotary_attention_forward(kparams, consts, x, mask_add):
    b, s, d = x.shape
    cosf, sinf, rot = consts
    out2 = fused_rotary_attention(
        x.reshape(b * s, d),
        kparams["wq"], kparams["wk"], kparams["wv"],
        kparams["bq"], kparams["bk"], kparams["bv"],
        rot, cosf, sinf, mask_add,
        kparams["wo"], kparams["bo"])
    return out2.reshape(b, s, d)


# ---------------------------------------------------------------------------
# Parameters (stored pre-transposed relative to torch nn.Linear.weight)
# ---------------------------------------------------------------------------
def init_params(key):
    k1, k2, k3, k4 = jax.random.split(key, 4)
    scale = 1.0 / math.sqrt(D_MODEL)
    return {
        "wqkv": jax.random.uniform(k1, (D_MODEL, 3 * D_MODEL), jnp.float32,
                                   -scale, scale),
        "bqkv": jax.random.uniform(k2, (3 * D_MODEL,), jnp.float32, -scale, scale),
        "wo": jax.random.uniform(k3, (D_MODEL, D_MODEL), jnp.float32,
                                 -scale, scale),
        "bo": jax.random.uniform(k4, (D_MODEL,), jnp.float32, -scale, scale),
    }


def prepare_kernel_params(p):
    d = D_MODEL
    return {
        "wq": p["wqkv"][:, 0 * d:1 * d],
        "wk": p["wqkv"][:, 1 * d:2 * d],
        "wv": p["wqkv"][:, 2 * d:3 * d],
        "bq": p["bqkv"][0 * d:1 * d].reshape(1, d),
        "bk": p["bqkv"][1 * d:2 * d].reshape(1, d),
        "bv": p["bqkv"][2 * d:3 * d].reshape(1, d),
        "wo": p["wo"],
        "bo": p["bo"].reshape(1, d),
    }


# ---------------------------------------------------------------------------
# Pure-JAX reference (mirrors the PyTorch module, eval mode)
# ---------------------------------------------------------------------------
def reference_forward(params, x, attn_mask):
    b, s, d = x.shape
    h, hd = NUM_HEADS, HEAD_DIM
    qkv = x.reshape(b * s, d) @ params["wqkv"] + params["bqkv"]
    qkv = qkv.reshape(b, s, 3, h, hd)
    q, k, v = qkv[:, :, 0], qkv[:, :, 1], qkv[:, :, 2]      # (B, S, H, hd)
    cos, sin = rope_tables(s, hd)
    cos_b, sin_b = cos[None, :, None, :], sin[None, :, None, :]

    def rope4(t):
        t1, t2 = t[..., :hd // 2], t[..., hd // 2:]
        return t * cos_b + jnp.concatenate([-t2, t1], axis=-1) * sin_b

    q, k = rope4(q), rope4(k)
    q = jnp.transpose(q, (0, 2, 1, 3)).reshape(b * h, s, hd)
    k = jnp.transpose(k, (0, 2, 1, 3)).reshape(b * h, s, hd)
    v = jnp.transpose(v, (0, 2, 1, 3)).reshape(b * h, s, hd)
    sc = jnp.einsum("bqd,bkd->bqk", q, k) / (hd ** 0.5)
    sc = jnp.where(attn_mask[None] != 0, -jnp.inf, sc)
    p = jax.nn.softmax(sc, axis=-1)
    ctx = jnp.einsum("bqk,bkd->bqd", p, v)
    ctx = ctx.reshape(b, h, s, hd).transpose(0, 2, 1, 3).reshape(b * s, d)
    return (ctx @ params["wo"] + params["bo"]).reshape(b, s, d)


if __name__ == "__main__":
    key = jax.random.PRNGKey(0)
    kp, kx = jax.random.split(key)
    params = init_params(kp)
    kparams = prepare_kernel_params(params)
    consts = make_rope_constants(BATCH, SEQ, NUM_HEADS, HEAD_DIM)

    x = jax.random.normal(kx, (BATCH, SEQ, D_MODEL), jnp.float32)
    # causal mask: nonzero above the diagonal == masked (torch masked_fill semantics)
    attn_mask = (jnp.arange(SEQ)[None, :] > jnp.arange(SEQ)[:, None]).astype(jnp.int32)
    mask_add = make_additive_mask(attn_mask, BATCH)

    out = rotary_attention_forward(kparams, consts, x, mask_add)
    out = jax.block_until_ready(out)

    ref = reference_forward(params, x, attn_mask)
    assert out.shape == (BATCH, SEQ, D_MODEL)
    assert jnp.allclose(out, ref, atol=5e-4, rtol=5e-4), "mismatch vs reference"
    print("KERNEL_OK")
</pallas_src>

<mosaic_0001>
module attributes {stable_mosaic.version = 11 : i64} {
  func.func @_fused_attn_kernel(%arg0: memref<16x32xf32, #tpu.memory_space<vmem>>, %arg1: memref<32x32xf32, #tpu.memory_space<vmem>>, %arg2: memref<32x32xf32, #tpu.memory_space<vmem>>, %arg3: memref<32x32xf32, #tpu.memory_space<vmem>>, %arg4: memref<1x32xf32, #tpu.memory_space<vmem>>, %arg5: memref<1x32xf32, #tpu.memory_space<vmem>>, %arg6: memref<1x32xf32, #tpu.memory_space<vmem>>, %arg7: memref<32x32xf32, #tpu.memory_space<vmem>>, %arg8: memref<16x32xf32, #tpu.memory_space<vmem>>, %arg9: memref<16x32xf32, #tpu.memory_space<vmem>>, %arg10: memref<16x16xf32, #tpu.memory_space<vmem>>, %arg11: memref<32x32xf32, #tpu.memory_space<vmem>>, %arg12: memref<1x32xf32, #tpu.memory_space<vmem>>, %arg13: memref<16x32xf32, #tpu.memory_space<vmem>>) attributes {dimension_semantics = [], scalar_prefetch = 0 : i64, scratch_operands = 0 : i64, tpu.core_type = #tpu.core_type<tc>} {
    %c0 = arith.constant 0 : index
    %c0_0 = arith.constant 0 : index
    %0 = vector.load %arg0[%c0, %c0_0] : memref<16x32xf32, #tpu.memory_space<vmem>>, vector<16x32xf32>
    %c0_1 = arith.constant 0 : index
    %c0_2 = arith.constant 0 : index
    %1 = vector.load %arg1[%c0_1, %c0_2] : memref<32x32xf32, #tpu.memory_space<vmem>>, vector<32x32xf32>
    %cst = arith.constant dense<0.000000e+00> : vector<16x32xf32>
    %2 = tpu.matmul %0, %1, %cst {dimension_numbers = #tpu.dot_dimension_numbers<[1], [0], [0], [1], [0, 0, 1, 1], [], []>} : vector<16x32xf32>, vector<32x32xf32>, vector<16x32xf32> -> vector<16x32xf32>
    %c0_3 = arith.constant 0 : index
    %c0_4 = arith.constant 0 : index
    %3 = vector.load %arg4[%c0_3, %c0_4] : memref<1x32xf32, #tpu.memory_space<vmem>>, vector<1x32xf32>
    %4 = vector.broadcast %3 : vector<1x32xf32> to vector<16x32xf32>
    %5 = arith.addf %2, %4 : vector<16x32xf32>
    %c0_5 = arith.constant 0 : index
    %c0_6 = arith.constant 0 : index
    %6 = vector.load %arg2[%c0_5, %c0_6] : memref<32x32xf32, #tpu.memory_space<vmem>>, vector<32x32xf32>
    %cst_7 = arith.constant dense<0.000000e+00> : vector<16x32xf32>
    %7 = tpu.matmul %0, %6, %cst_7 {dimension_numbers = #tpu.dot_dimension_numbers<[1], [0], [0], [1], [0, 0, 1, 1], [], []>} : vector<16x32xf32>, vector<32x32xf32>, vector<16x32xf32> -> vector<16x32xf32>
    %c0_8 = arith.constant 0 : index
    %c0_9 = arith.constant 0 : index
    %8 = vector.load %arg5[%c0_8, %c0_9] : memref<1x32xf32, #tpu.memory_space<vmem>>, vector<1x32xf32>
    %9 = vector.broadcast %8 : vector<1x32xf32> to vector<16x32xf32>
    %10 = arith.addf %7, %9 : vector<16x32xf32>
    %c0_10 = arith.constant 0 : index
    %c0_11 = arith.constant 0 : index
    %11 = vector.load %arg3[%c0_10, %c0_11] : memref<32x32xf32, #tpu.memory_space<vmem>>, vector<32x32xf32>
    %cst_12 = arith.constant dense<0.000000e+00> : vector<16x32xf32>
    %12 = tpu.matmul %0, %11, %cst_12 {dimension_numbers = #tpu.dot_dimension_numbers<[1], [0], [0], [1], [0, 0, 1, 1], [], []>} : vector<16x32xf32>, vector<32x32xf32>, vector<16x32xf32> -> vector<16x32xf32>
    %c0_13 = arith.constant 0 : index
    %c0_14 = arith.constant 0 : index
    %13 = vector.load %arg6[%c0_13, %c0_14] : memref<1x32xf32, #tpu.memory_space<vmem>>, vector<1x32xf32>
    %14 = vector.broadcast %13 : vector<1x32xf32> to vector<16x32xf32>
    %15 = arith.addf %12, %14 : vector<16x32xf32>
    %c0_15 = arith.constant 0 : index
    %c0_16 = arith.constant 0 : index
    %16 = vector.load %arg8[%c0_15, %c0_16] : memref<16x32xf32, #tpu.memory_space<vmem>>, vector<16x32xf32>
    %c0_17 = arith.constant 0 : index
    %c0_18 = arith.constant 0 : index
    %17 = vector.load %arg9[%c0_17, %c0_18] : memref<16x32xf32, #tpu.memory_space<vmem>>, vector<16x32xf32>
    %c0_19 = arith.constant 0 : index
    %c0_20 = arith.constant 0 : index
    %18 = vector.load %arg7[%c0_19, %c0_20] : memref<32x32xf32, #tpu.memory_space<vmem>>, vector<32x32xf32>
    %19 = arith.mulf %5, %16 : vector<16x32xf32>
    %cst_21 = arith.constant dense<0.000000e+00> : vector<16x32xf32>
    %20 = tpu.matmul %5, %18, %cst_21 {dimension_numbers = #tpu.dot_dimension_numbers<[1], [0], [0], [1], [0, 0, 1, 1], [], []>} : vector<16x32xf32>, vector<32x32xf32>, vector<16x32xf32> -> vector<16x32xf32>
    %21 = arith.mulf %20, %17 : vector<16x32xf32>
    %22 = arith.addf %19, %21 : vector<16x32xf32>
    %23 = arith.mulf %10, %16 : vector<16x32xf32>
    %cst_22 = arith.constant dense<0.000000e+00> : vector<16x32xf32>
    %24 = tpu.matmul %10, %18, %cst_22 {dimension_numbers = #tpu.dot_dimension_numbers<[1], [0], [0], [1], [0, 0, 1, 1], [], []>} : vector<16x32xf32>, vector<32x32xf32>, vector<16x32xf32> -> vector<16x32xf32>
    %25 = arith.mulf %24, %17 : vector<16x32xf32>
    %26 = arith.addf %23, %25 : vector<16x32xf32>
    %27 = vector.extract_strided_slice %22 {offsets = [0, 0], sizes = [16, 8], strides = [1, 1]} : vector<16x32xf32> to vector<16x8xf32>
    %28 = vector.shape_cast %27 : vector<16x8xf32> to vector<1x16x8xf32>
    %29 = vector.extract_strided_slice %22 {offsets = [0, 8], sizes = [16, 8], strides = [1, 1]} : vector<16x32xf32> to vector<16x8xf32>
    %30 = vector.shape_cast %29 : vector<16x8xf32> to vector<1x16x8xf32>
    %31 = vector.extract_strided_slice %22 {offsets = [0, 16], sizes = [16, 8], strides = [1, 1]} : vector<16x32xf32> to vector<16x8xf32>
    %32 = vector.shape_cast %31 : vector<16x8xf32> to vector<1x16x8xf32>
    %33 = vector.extract_strided_slice %22 {offsets = [0, 24], sizes = [16, 8], strides = [1, 1]} : vector<16x32xf32> to vector<16x8xf32>
    %34 = vector.shape_cast %33 : vector<16x8xf32> to vector<1x16x8xf32>
    %35 = tpu.concatenate %28, %30, %32, %34 in 0 : vector<1x16x8xf32>, vector<1x16x8xf32>, vector<1x16x8xf32>, vector<1x16x8xf32> -> vector<4x16x8xf32>
    %36 = vector.extract_strided_slice %26 {offsets = [0, 0], sizes = [16, 8], strides = [1, 1]} : vector<16x32xf32> to vector<16x8xf32>
    %37 = vector.shape_cast %36 : vector<16x8xf32> to vector<1x16x8xf32>
    %38 = vector.extract_strided_slice %26 {offsets = [0, 8], sizes = [16, 8], strides = [1, 1]} : vector<16x32xf32> to vector<16x8xf32>
    %39 = vector.shape_cast %38 : vector<16x8xf32> to vector<1x16x8xf32>
    %40 = vector.extract_strided_slice %26 {offsets = [0, 16], sizes = [16, 8], strides = [1, 1]} : vector<16x32xf32> to vector<16x8xf32>
    %41 = vector.shape_cast %40 : vector<16x8xf32> to vector<1x16x8xf32>
    %42 = vector.extract_strided_slice %26 {offsets = [0, 24], sizes = [16, 8], strides = [1, 1]} : vector<16x32xf32> to vector<16x8xf32>
    %43 = vector.shape_cast %42 : vector<16x8xf32> to vector<1x16x8xf32>
    %44 = tpu.concatenate %37, %39, %41, %43 in 0 : vector<1x16x8xf32>, vector<1x16x8xf32>, vector<1x16x8xf32>, vector<1x16x8xf32> -> vector<4x16x8xf32>
    %45 = vector.extract_strided_slice %15 {offsets = [0, 0], sizes = [16, 8], strides = [1, 1]} : vector<16x32xf32> to vector<16x8xf32>
    %46 = vector.shape_cast %45 : vector<16x8xf32> to vector<1x16x8xf32>
    %47 = vector.extract_strided_slice %15 {offsets = [0, 8], sizes = [16, 8], strides = [1, 1]} : vector<16x32xf32> to vector<16x8xf32>
    %48 = vector.shape_cast %47 : vector<16x8xf32> to vector<1x16x8xf32>
    %49 = vector.extract_strided_slice %15 {offsets = [0, 16], sizes = [16, 8], strides = [1, 1]} : vector<16x32xf32> to vector<16x8xf32>
    %50 = vector.shape_cast %49 : vector<16x8xf32> to vector<1x16x8xf32>
    %51 = vector.extract_strided_slice %15 {offsets = [0, 24], sizes = [16, 8], strides = [1, 1]} : vector<16x32xf32> to vector<16x8xf32>
    %52 = vector.shape_cast %51 : vector<16x8xf32> to vector<1x16x8xf32>
    %53 = tpu.concatenate %46, %48, %50, %52 in 0 : vector<1x16x8xf32>, vector<1x16x8xf32>, vector<1x16x8xf32>, vector<1x16x8xf32> -> vector<4x16x8xf32>
    "tpu.trace_start"() <{level = 10 : i32, message = "hqd,hkd->hqk"}> : () -> ()
    %cst_23 = arith.constant dense<0.000000e+00> : vector<4x16x16xf32>
    %54 = tpu.matmul %35, %44, %cst_23 {dimension_numbers = #tpu.dot_dimension_numbers<[2], [2], [1], [1], [0, 0, 0, 1, 1, 1], [0], [0]>} : vector<4x16x8xf32>, vector<4x16x8xf32>, vector<4x16x16xf32> -> vector<4x16x16xf32>
    "tpu.trace_stop"() : () -> ()
    %cst_24 = arith.constant 0.353553385 : f32
    %55 = vector.broadcast %cst_24 : f32 to vector<4x16x16xf32>
    %56 = arith.mulf %54, %55 : vector<4x16x16xf32>
    %c0_25 = arith.constant 0 : index
    %c0_26 = arith.constant 0 : index
    %57 = vector.load %arg10[%c0_25, %c0_26] : memref<16x16xf32, #tpu.memory_space<vmem>>, vector<16x16xf32>
    %58 = vector.shape_cast %57 : vector<16x16xf32> to vector<1x16x16xf32>
    %59 = vector.broadcast %58 : vector<1x16x16xf32> to vector<4x16x16xf32>
    %60 = arith.addf %56, %59 : vector<4x16x16xf32>
    %cst_27 = arith.constant dense<0xFF800000> : vector<4x16xf32>
    %61 = vector.multi_reduction <maximumf>, %60, %cst_27 [2] : vector<4x16x16xf32> to vector<4x16xf32>
    %62 = vector.shape_cast %61 : vector<4x16xf32> to vector<4x16x1xf32>
    %63 = vector.broadcast %62 : vector<4x16x1xf32> to vector<4x16x16xf32>
    %64 = arith.subf %60, %63 : vector<4x16x16xf32>
    %65 = math.exp %64 : vector<4x16x16xf32>
    %cst_28 = arith.constant dense<0.000000e+00> : vector<4x16xf32>
    %66 = vector.multi_reduction <add>, %65, %cst_28 [2] : vector<4x16x16xf32> to vector<4x16xf32>
    %67 = vector.shape_cast %66 : vector<4x16xf32> to vector<4x16x1xf32>
    %68 = tpu.reciprocal %67 {approx = true} : vector<4x16x1xf32> -> vector<4x16x1xf32>
    %69 = arith.mulf %67, %68 : vector<4x16x1xf32>
    %cst_29 = arith.constant 2.000000e+00 : f32
    %70 = vector.broadcast %cst_29 : f32 to vector<4x16x1xf32>
    %71 = arith.subf %70, %69 : vector<4x16x1xf32>
    %72 = arith.mulf %68, %71 : vector<4x16x1xf32>
    %73 = vector.broadcast %72 : vector<4x16x1xf32> to vector<4x16x16xf32>
    %74 = arith.mulf %65, %73 : vector<4x16x16xf32>
    "tpu.trace_start"() <{level = 10 : i32, message = "hqk,hkd->hqd"}> : () -> ()
    %cst_30 = arith.constant dense<0.000000e+00> : vector<4x16x8xf32>
    %75 = tpu.matmul %74, %53, %cst_30 {dimension_numbers = #tpu.dot_dimension_numbers<[2], [1], [1], [2], [0, 0, 0, 1, 1, 2], [0], [0]>} : vector<4x16x16xf32>, vector<4x16x8xf32>, vector<4x16x8xf32> -> vector<4x16x8xf32>
    "tpu.trace_stop"() : () -> ()
    %76 = vector.extract_strided_slice %75 {offsets = [0, 0, 0], sizes = [1, 16, 8], strides = [1, 1, 1]} : vector<4x16x8xf32> to vector<1x16x8xf32>
    %77 = vector.shape_cast %76 : vector<1x16x8xf32> to vector<16x8xf32>
    %78 = vector.extract_strided_slice %75 {offsets = [1, 0, 0], sizes = [1, 16, 8], strides = [1, 1, 1]} : vector<4x16x8xf32> to vector<1x16x8xf32>
    %79 = vector.shape_cast %78 : vector<1x16x8xf32> to vector<16x8xf32>
    %80 = vector.extract_strided_slice %75 {offsets = [2, 0, 0], sizes = [1, 16, 8], strides = [1, 1, 1]} : vector<4x16x8xf32> to vector<1x16x8xf32>
    %81 = vector.shape_cast %80 : vector<1x16x8xf32> to vector<16x8xf32>
    %82 = vector.extract_strided_slice %75 {offsets = [3, 0, 0], sizes = [1, 16, 8], strides = [1, 1, 1]} : vector<4x16x8xf32> to vector<1x16x8xf32>
    %83 = vector.shape_cast %82 : vector<1x16x8xf32> to vector<16x8xf32>
    %84 = tpu.concatenate %77, %79, %81, %83 in 1 : vector<16x8xf32>, vector<16x8xf32>, vector<16x8xf32>, vector<16x8xf32> -> vector<16x32xf32>
    %c0_31 = arith.constant 0 : index
    %c0_32 = arith.constant 0 : index
    %85 = vector.load %arg11[%c0_31, %c0_32] : memref<32x32xf32, #tpu.memory_space<vmem>>, vector<32x32xf32>
    %cst_33 = arith.constant dense<0.000000e+00> : vector<16x32xf32>
    %86 = tpu.matmul %84, %85, %cst_33 {dimension_numbers = #tpu.dot_dimension_numbers<[1], [0], [0], [1], [0, 0, 1, 1], [], []>} : vector<16x32xf32>, vector<32x32xf32>, vector<16x32xf32> -> vector<16x32xf32>
    %c0_34 = arith.constant 0 : index
    %c0_35 = arith.constant 0 : index
    %87 = vector.load %arg12[%c0_34, %c0_35] : memref<1x32xf32, #tpu.memory_space<vmem>>, vector<1x32xf32>
    %88 = vector.broadcast %87 : vector<1x32xf32> to vector<16x32xf32>
    %89 = arith.addf %86, %88 : vector<16x32xf32>
    %c0_36 = arith.constant 0 : index
    %c0_37 = arith.constant 0 : index
    %90 = vector.load %arg13[%c0_36, %c0_37] : memref<16x32xf32, #tpu.memory_space<vmem>>, vector<16x32xf32>
    tpu.vector_store %arg13[%c0_36, %c0_37], %89 {strides = array<i32>} : memref<16x32xf32, #tpu.memory_space<vmem>>, vector<16x32xf32>,
    return
  }
}

</mosaic_0001>

<bundles_post_ra>
// kernel: rotary_attention_forward.1
= control target key start
LH: loop header
LB: loop body
LE: loop exit
PB: predicated region body
PF: predicated region fallthrough
CT: control target
= control target key end

     0   :  { %18 = vsyncpa [#allocation3], 0  ;;  %s2385_s0 = inlined_call_operand.vmem [shape: f32[16,32], index: 0, kind: input, shape index: {}]   ;;  %s2386_s1 = inlined_call_operand.hbm [shape: f32[32,32], index: 1, kind: input, shape index: {}]   ;;  %s2387_s2 = inlined_call_operand.hbm [shape: f32[32,32], index: 2, kind: input, shape index: {}]   ;;  %s2388_s3 = inlined_call_operand.hbm [shape: f32[32,32], index: 3, kind: input, shape index: {}]   ;;  %s2389_s4 = inlined_call_operand.vmem [shape: f32[1,32], index: 4, kind: input, shape index: {}]   ;;  %s2390_s5 = inlined_call_operand.hbm [shape: f32[1,32], index: 5, kind: input, shape index: {}]   ;;  %s2391_s6 = inlined_call_operand.vmem [shape: f32[1,32], index: 6, kind: input, shape index: {}]   ;;  %s2392_s7 = inlined_call_operand.hbm [shape: f32[32,32], index: 7, kind: input, shape index: {}]   ;;  %s2393_s8 = inlined_call_operand.hbm [shape: f32[16,32], index: 8, kind: input, shape index: {}]   ;;  %s2394_s9 = inlined_call_operand.hbm [shape: f32[16,32], index: 9, kind: input, shape index: {}]   ;;  %s2395_s10 = inlined_call_operand.hbm [shape: f32[16,16], index: 10, kind: input, shape index: {}]   ;;  %s2396_s11 = inlined_call_operand.hbm [shape: f32[32,32], index: 11, kind: input, shape index: {}]   ;;  %s2397_s12 = inlined_call_operand.vmem [shape: f32[1,32], index: 12, kind: input, shape index: {}]   ;;  %s2398_s13 = inlined_call_operand.hbm [shape: f32[16,32], index: 13, kind: output, shape index: {}]  }
   0x1   :  { %19 = vsyncpa [#allocation6], 0 }
   0x2   :  { %20 = vsyncpa [#allocation9], 0 }
   0x3   :  { %21 = vsyncpa [#allocation12], 0 }
   0x4   :  { %22 = vsyncpa [#allocation15], 0 }
   0x5   :  { %23 = vsyncpa [#allocation4], 0  ;;  %s2087_s25 = smov [#allocation5]   ;;  %s2088_s27 = smov [#allocation8]  }
   0x6   :  { %s43_s26 = sshll.u32 %s2087_s25, 4  ;;  %s70_s28 = sshll.u32 %s2088_s27, 4  ;;  %s44_s26 = int_to_ptr.vmem [resolvable:$true] %s43_s26  ;;  %s71_s28 = int_to_ptr.vmem [resolvable:$true] %s70_s28 }
   0x7   :  { %s1883_s29 = scalar_lea.vmem %s44_s26, 512  ;;  %p1888_p1 = scmp.lt.s32.totalorder %s44_s26, %s44_s26 }
   0x8   :  { %p1884_p0 = scmp.ne.s32.totalorder %s44_s26, %s1883_s29  ;;  %p1889_p2 = scmp.lt.s32.totalorder %s1883_s29, %s1883_s29 }
   0xa   :  { %p1890_p3 = por %p1889_p2, %p1888_p1 }
   0xc   :  { %p1891_p4 = pnand %p1890_p3, %p1884_p0 }
   0xe   :  { %1894 = shalt.err (!%p1891_p4)
}
   0xf   :  { %s2089_s30 = smov 128   ;;  %s2090_s14 = smov 8  }
  0x10   :  { %49 = dma.hbm_to_vmem [thread:$0]  %s2387_s2, 512, %s44_s26, [#allocation6], %s2089_s30, %s2089_s30, %s2090_s14  }
  0x11   :  { %s1903_s17 = scalar_lea.vmem %s71_s28, 16  ;;  %s1907_s18 = scalar_lea.vmem %s71_s28, 32 }
  0x12   :  { %p1904_p5 = scmp.ne.s32.totalorder %s71_s28, %s1903_s17  ;;  %p1908_p6 = scmp.lt.s32.totalorder %s71_s28, %s71_s28 }
  0x13   :  { %p1909_p7 = scmp.lt.s32.totalorder %s1907_s18, %s1903_s17 }
  0x15   :  { %p1910_p8 = por %p1909_p7, %p1908_p6 }
  0x17   :  { %p1911_p9 = pnand %p1910_p8, %p1904_p5 }
  0x19   :  { %1914 = shalt.err (!%p1911_p9)
}
  0x1a   :  { %73 = dma.hbm_to_vmem [thread:$0]  %s2390_s5, 16, %s71_s28, [#allocation9]  }
  0x1b   :  { %s2091_s21 = smov [#allocation11]   ;;  %s2092_s23 = smov [#allocation14]  }
  0x1c   :  { %s93_s22 = sshll.u32 %s2091_s21, 4  ;;  %s117_s24 = sshll.u32 %s2092_s23, 4  ;;  %s94_s22 = int_to_ptr.vmem [resolvable:$true] %s93_s22  ;;  %s118_s24 = int_to_ptr.vmem [resolvable:$true] %s117_s24 }
  0x1d   :  { %s1923_s25 = scalar_lea.vmem %s94_s22, 256  ;;  %p1928_p11 = scmp.lt.s32.totalorder %s94_s22, %s94_s22 }
  0x1e   :  { %p1924_p10 = scmp.ne.s32.totalorder %s94_s22, %s1923_s25  ;;  %p1929_p12 = scmp.lt.s32.totalorder %s1923_s25, %s1923_s25 }
  0x20   :  { %p1930_p13 = por %p1929_p12, %p1928_p11 }
  0x22   :  { %p1931_p0 = pnand %p1930_p13, %p1924_p10 }
  0x24   :  { %1934 = shalt.err (!%p1931_p0)
}
  0x25   :  { %99 = dma.hbm_to_vmem [thread:$0]  %s2393_s8, 256, %s94_s22, [#allocation12], %s2089_s30, %s2089_s30, %s2090_s14  }
  0x26   :  { %s1943_s5 = scalar_lea.vmem %s118_s24, 256  ;;  %p1948_p2 = scmp.lt.s32.totalorder %s118_s24, %s118_s24 }
  0x27   :  { %p1944_p1 = scmp.ne.s32.totalorder %s118_s24, %s1943_s5  ;;  %p1949_p3 = scmp.lt.s32.totalorder %s1943_s5, %s1943_s5 }
  0x29   :  { %p1950_p4 = por %p1949_p3, %p1948_p2 }
  0x2b   :  { %p1951_p5 = pnand %p1950_p4, %p1944_p1 }
  0x2d   :  { %1954 = shalt.err (!%p1951_p5)
}
  0x2e   :  { %123 = dma.hbm_to_vmem [thread:$0]  %s2395_s10, 256, %s118_s24, [#allocation15], %s2089_s30, %s2089_s30, %s2090_s14  }
  0x2f   :  { %s2093_s29 = smov [#allocation2]   ;;  %s2094_s16 = smov [#allocation7]  }
  0x30   :  { %s31_s15 = sshll.u32 %s2093_s29, 4  ;;  %s55_s17 = sshll.u32 %s2094_s16, 4  ;;  %s32_s15 = int_to_ptr.vmem [resolvable:$true] %s31_s15  ;;  %s56_s17 = int_to_ptr.vmem [resolvable:$true] %s55_s17 }
  0x31   :  { %s1963_s8 = scalar_lea.vmem %s32_s15, 512  ;;  %p1968_p7 = scmp.lt.s32.totalorder %s32_s15, %s32_s15 }
  0x32   :  { %p1964_p6 = scmp.ne.s32.totalorder %s32_s15, %s1963_s8  ;;  %p1969_p8 = scmp.lt.s32.totalorder %s1963_s8, %s1963_s8 }
  0x34   :  { %p1970_p9 = por %p1969_p8, %p1968_p7 }
  0x36   :  { %p1971_p10 = pnand %p1970_p9, %p1964_p6 }
  0x38   :  { %1974 = shalt.err (!%p1971_p10)
}
  0x39   :  { %37 = dma.hbm_to_vmem [thread:$0]  %s2386_s1, 512, %s32_s15, [#allocation3], %s2089_s30, %s2089_s30, %s2090_s14  }
  0x3a   :  { %s1983_s10 = scalar_lea.vmem %s56_s17, 512  ;;  %p1988_p12 = scmp.lt.s32.totalorder %s56_s17, %s56_s17 }
  0x3b   :  { %p1984_p11 = scmp.ne.s32.totalorder %s56_s17, %s1983_s10  ;;  %p1989_p13 = scmp.lt.s32.totalorder %s1983_s10, %s1983_s10 }
  0x3d   :  { %p1990_p0 = por %p1989_p13, %p1988_p12 }
  0x3f   :  { %p1991_p1 = pnand %p1990_p0, %p1984_p11 }
  0x41   :  { %1994 = shalt.err (!%p1991_p1)
}
  0x42   :  { %61 = dma.hbm_to_vmem [thread:$0]  %s2388_s3, 512, %s56_s17, [#allocation6], %s2089_s30, %s2089_s30, %s2090_s14  }
  0x43   :  { %s2095_s22 = smov [#allocation10]   ;;  %s2096_s24 = smov [#allocation13]  }
  0x44   :  { %s81_s23 = sshll.u32 %s2095_s22, 4  ;;  %s105_s25 = sshll.u32 %s2096_s24, 4  ;;  %s82_s23 = int_to_ptr.vmem [resolvable:$true] %s81_s23  ;;  %s106_s25 = int_to_ptr.vmem [resolvable:$true] %s105_s25 }
  0x45   :  { %s2003_s1 = scalar_lea.vmem %s82_s23, 512  ;;  %p2008_p3 = scmp.lt.s32.totalorder %s82_s23, %s82_s23 }
  0x46   :  { %p2004_p2 = scmp.ne.s32.totalorder %s82_s23, %s2003_s1  ;;  %p2009_p4 = scmp.lt.s32.totalorder %s2003_s1, %s2003_s1 }
  0x48   :  { %p2010_p5 = por %p2009_p4, %p2008_p3 }
  0x4a   :  { %p2011_p6 = pnand %p2010_p5, %p2004_p2 }
  0x4c   :  { %2014 = shalt.err (!%p2011_p6)
}
  0x4d   :  { %87 = dma.hbm_to_vmem [thread:$0]  %s2392_s7, 512, %s82_s23, [#allocation9], %s2089_s30, %s2089_s30, %s2090_s14  }
  0x4e   :  { %s2023_s3 = scalar_lea.vmem %s106_s25, 256  ;;  %p2028_p8 = scmp.lt.s32.totalorder %s106_s25, %s106_s25 }
  0x4f   :  { %p2024_p7 = scmp.ne.s32.totalorder %s106_s25, %s2023_s3  ;;  %p2029_p9 = scmp.lt.s32.totalorder %s2023_s3, %s2023_s3 }
  0x51   :  { %p2030_p10 = por %p2029_p9, %p2028_p8 }
  0x53   :  { %p2031_p11 = pnand %p2030_p10, %p2024_p7 }
  0x55   :  { %2034 = shalt.err (!%p2031_p11)
}
  0x56   :  { %111 = dma.hbm_to_vmem [thread:$0]  %s2394_s9, 256, %s106_s25, [#allocation12], %s2089_s30, %s2089_s30, %s2090_s14  }
  0x57   :  { %s2097_s28 = smov [#allocation16]  }
  0x58   :  { %s129_s29 = sshll.u32 %s2097_s28, 4  ;;  %s130_s29 = int_to_ptr.vmem [resolvable:$true] %s129_s29 }
  0x59   :  { %s2043_s15 = scalar_lea.vmem %s130_s29, 512  ;;  %p2048_p13 = scmp.lt.s32.totalorder %s130_s29, %s130_s29 }
  0x5a   :  { %p2044_p12 = scmp.ne.s32.totalorder %s130_s29, %s2043_s15  ;;  %p2049_p0 = scmp.lt.s32.totalorder %s2043_s15, %s2043_s15 }
  0x5c   :  { %p2050_p1 = por %p2049_p0, %p2048_p13 }
  0x5e   :  { %p2051_p2 = pnand %p2050_p1, %p2044_p12 }
  0x60   :  { %2054 = shalt.err (!%p2051_p2)
}
  0x61   :  { %135 = dma.hbm_to_vmem [thread:$0]  %s2396_s11, 512, %s130_s29, [#allocation15], %s2089_s30, %s2089_s30, %s2090_s14  }
  0x62   :  { %2075 = dma.done.wait [#allocation3], 512  }
  0x63   :  { %2076 = vsyncadd [#allocation3], 4294966784 }
  0x64   :  { %2077 = dma.done.wait [#allocation6], 1024  }
  0x65   :  { %2078 = vsyncadd [#allocation6], 4294966272 }
  0x66   :  { %2079 = dma.done.wait [#allocation9], 528  }
  0x67   :  { %2080 = vsyncadd [#allocation9], 4294966768 }
  0x68   :  { %2081 = dma.done.wait [#allocation12], 512  }
  0x69   :  { %2082 = vsyncadd [#allocation12], 4294966784 }
  0x6a   :  { %2083 = dma.done.wait [#allocation15], 768  }
  0x6b   :  { %2084 = vsyncadd [#allocation15], 4294966528  ;;  %v170_v0 = vld [vmem:[#allocation2 + $0x18] sm:$0xff]  ;;  %v169_v2 = vld [vmem:[#allocation2 + $0x10] sm:$0xff]  ;;  %vm178_vm0 = vcmask 261120   ;;  %vm662_vm1 = vcmask 64512  }
  0x6c   :  { %v263_v1 = vld [vmem:[#allocation5 + $0x18] sm:$0xff]  ;;  %1704 = vmatprep.subr.mxu0 %v170_v0  ;;  %v262_v3 = vld [vmem:[#allocation5 + $0x10] sm:$0xff]  ;;  %v168_v4 = vld [vmem:[#allocation2 + $0x8] sm:$0xff]  ;;  %s2099_s19 = smov 120   ;;  %s2100_s10 = smov 104   ;;  %vm1013_vm2 = vcmask 130048  }
  0x6d   :  { %1715 = vmatprep.subr.mxu1 %v263_v1  ;;  %1705 = vmatpush3.msra.mxu0 %v170_v0  ;;  %v261_v5 = vld [vmem:[#allocation5 + $0x8] sm:$0xff]  ;;  %v167_v6 = vld [vmem:[#allocation2] sm:$0xff]  ;;  %v349_v10 = vld [vmem:[#allocation7 + $0x18] sm:$0xff]  ;;  %s2102_s22 = smov 24   ;;  %vm1478_vm3 = vcmask 195584   ;;  %s2103_s25 = smov [#allocation17]  }
  0x6e   :  { %1716 = vmatpush3.msra.mxu1 %v263_v1  ;;  %1706 = vmatprep.subr.mxu0 %v169_v2  ;;  %v260_v7 = vld [vmem:[#allocation5] sm:$0xff]  ;;  %v166_v9 = vld [vmem:[%s2385_s0 + $0x8] sm:$0xff]  ;;  %v348_v12 = vld [vmem:[#allocation7 + $0x10] sm:$0xff]  ;;  %s1580_s1 = sshll.u32 %s2103_s25, 4  ;;  %s1581_s1 = int_to_ptr.vmem [resolvable:$true] %s1580_s1 }
  0x6f   :  { %1717 = vmatprep.subr.mxu1 %v262_v3  ;;  %1707 = vmatpush3.msra.mxu0 %v169_v2  ;;  %v165_v8 = vld [vmem:[%s2385_s0] sm:$0xff]  ;;  %v347_v13 = vld [vmem:[#allocation7 + $0x8] sm:$0xff]  ;;  %v438_v15 = vld [vmem:[#allocation10 + $0x10] sm:$0xff]  ;;  %s2055_s2 = scalar_lea.vmem %s1581_s1, 256  ;;  %p2060_p4 = scmp.lt.s32.totalorder %s1581_s1, %s1581_s1 }
  0x70   :  { %1718 = vmatpush3.msra.mxu1 %v262_v3  ;;  %1708 = vmatprep.subr.mxu0 %v168_v4  ;;  %v439_v11 = vld [vmem:[#allocation10 + $0x18] sm:$0xff]  ;;  %v437_v16 = vld [vmem:[#allocation10 + $0x8] sm:$0xff]  ;;  %v436_v17 = vld [vmem:[#allocation10] sm:$0xff]  ;;  %p2056_p3 = scmp.ne.s32.totalorder %s1581_s1, %s2055_s2  ;;  %p2061_p5 = scmp.lt.s32.totalorder %s2055_s2, %s2055_s2 }
  0x71   :  { %1719 = vmatprep.subr.mxu1 %v261_v5  ;;  %1709 = vmatpush3.msra.mxu0 %v168_v4  ;;  %v346_v14 = vld [vmem:[#allocation7] sm:$0xff]  ;;  %v433_v29 = vld [vmem:[#allocation11 + $0x8] sm:$0xff]  ;;  %v434_v35 = vld [vmem:[#allocation13] sm:$0xff] }
  0x72   :  { %1720 = vmatpush3.msra.mxu1 %v261_v5  ;;  %1710 = vmatprep.subr.mxu0 %v167_v6  ;;  %v1596_v18 = vld [vmem:[%s2389_s4] ss:$0 sm:$0xff]  ;;  %v432_v32 = vld [vmem:[#allocation11] sm:$0xff]  ;;  %s2098_s4 = smov 112   ;;  %v1004_v2 = vld [vmem:[#allocation14 + $0x8] sm:$0xff]  ;;  %p2062_p6 = por %p2061_p5, %p2060_p4 }
  0x73   :  { %1721 = vmatprep.subr.mxu1 %v260_v7  ;;  %1711 = vmatpush3.msra.mxu0 %v167_v6  ;;  %v1599_v21 = vld [vmem:[#allocation8] ss:$0 sm:$0xff]  ;;  %v1003_v5 = vld [vmem:[#allocation14] sm:$0xff] }
  0x74   :  { %1712 = vmatprep.mubr.msk.f32.mxu0 %vm178_vm0, %v165_v8  ;;  %1722 = vmatpush3.msra.mxu1 %v260_v7  ;;  %v435_v31 = vld [vmem:[#allocation13 + $0x8] sm:$0xff]  ;;  %p2063_p7 = pnand %p2062_p6, %p2056_p3 }
  0x75   :  { %1723 = vmatprep.mubr.msk.f32.mxu1 %vm178_vm0, %v165_v8  ;;  %1713 = vmatmul.mubr.msk.f32.vlgmr.msra.gmra.mxu0 %vm178_vm0, %v166_v9  ;;  %v1602_v54 = vld [vmem:[%s2391_s6] ss:$0 sm:$0xff]  ;;  %s2101_s6 = smov 16  }
  0x76   :  { %1724 = vmatmul.mubr.msk.f32.vlgmr.msra.gmra.mxu1 %vm178_vm0, %v166_v9  ;;  %1726 = vmatprep.subr.mxu0 %v349_v10 }
  0x77   :  { %1734 = vmatprep.mubr.msk.f32.mxu0 %vm178_vm0, %v165_v8  ;;  %1727 = vmatpush3.msra.mxu0 %v349_v10 }
  0x78   :  { %1737 = vmatprep.subr.mxu1 %v439_v11  ;;  %1728 = vmatprep.subr.mxu0 %v348_v12 }
  0x79   :  { %1738 = vmatpush3.msra.mxu1 %v439_v11  ;;  %1729 = vmatpush3.msra.mxu0 %v348_v12 }
  0x7a   :  { %1730 = vmatprep.subr.mxu0 %v347_v13  ;;  %1739 = vmatprep.subr.mxu1 %v438_v15 }
  0x7b   :  { %1731 = vmatpush3.msra.mxu0 %v347_v13  ;;  %1740 = vmatpush3.msra.mxu1 %v438_v15 }
  0x7c   :  { %1732 = vmatprep.subr.mxu0 %v346_v14  ;;  %1741 = vmatprep.subr.mxu1 %v437_v16 }
  0x7d   :  { %1733 = vmatpush3.msra.mxu0 %v346_v14  ;;  %1742 = vmatpush3.msra.mxu1 %v437_v16 }
  0x7e   :  { %1735 = vmatmul.mubr.msk.f32.vlgmr.msra.gmra.mxu0 %vm178_vm0, %v166_v9  ;;  %1748 = vmatprep.subr.mxu0 %v439_v11 }
  0x7f   :  { %1749 = vmatpush3.msra.mxu0 %v439_v11  ;;  %1743 = vmatprep.subr.mxu1 %v436_v17 }
  0x80   :  { %1750 = vmatprep.subr.mxu0 %v438_v15  ;;  %1744 = vmatpush3.msra.mxu1 %v436_v17 }
  0x81   :  { %1751 = vmatpush3.msra.mxu0 %v438_v15 }
  0x82   :  { %1752 = vmatprep.subr.mxu0 %v437_v16 }
  0x83   :  { %1753 = vmatpush3.msra.mxu0 %v437_v16 }
  0x84   :  { %1754 = vmatprep.subr.mxu0 %v436_v17 }
  0x85   :  { %1755 = vmatpush3.msra.mxu0 %v436_v17 }
 0x135   :  { %v1714_v19 = vpop.f32.mrf.mxu0 }
 0x136   :  { %v1725_v20 = vpop.f32.mrf.mxu1  ;;  %v257_v22 = vadd.f32 %v1714_v19, %v1596_v18 }
 0x137   :  { %v251_v23 = vpop.f32.mrf.mxu0  ;;  %v343_v27 = vadd.f32 %v1725_v20, %v1599_v21 }
 0x138   :  { %v337_v24 = vpop.f32.mrf.mxu1  ;;  %v252_v25 = vadd.f32 %v1596_v18, %v251_v23  ;;  %v441_v46 = vmul.f32 %v433_v29, %v257_v22 }
 0x139   :  { %v338_v26 = vadd.f32 %v1599_v21, %v337_v24  ;;  %v528_v36 = vmul.f32 %v433_v29, %v343_v27 }
 0x13a   :  { %1745 = vmatprep.mubr.msk.f32.mxu1 %vm178_vm0, %v252_v25  ;;  %v440_v38 = vmul.f32 %v432_v32, %v252_v25 }
 0x13b   :  { %1756 = vmatprep.mubr.msk.f32.mxu0 %vm178_vm0, %v338_v26  ;;  %1746 = vmatmul.mubr.msk.f32.vlgmr.msra.gmra.mxu1 %vm178_vm0, %v257_v22  ;;  %v527_v39 = vmul.f32 %v432_v32, %v338_v26 }
 0x13c   :  { %1757 = vmatmul.mubr.msk.f32.vlgmr.msra.gmra.mxu0 %vm178_vm0, %v343_v27 }
 0x13e   :  { %v1736_v28 = vpop.f32.mrf.mxu0 }
 0x13f   :  { %v2272_v57 = vadd.f32 %v1736_v28, %v1602_v54 }
 0x140   :  { %v2244_v30 = vpop.f32.mrf.mxu0 }
 0x141   :  { %v2284_v62 = vadd.f32 %v1602_v54, %v2244_v30 }
 0x1fb   :  { %v1747_v33 = vpop.f32.mrf.mxu1 }
 0x1fc   :  { %v1758_v34 = vpop.f32.mrf.mxu0  ;;  %v524_v42 = vmul.f32 %v1747_v33, %v435_v31 }
 0x1fd   :  { %v611_v37 = vmul.f32 %v1758_v34, %v435_v31  ;;  %v514_v40 = vpop.f32.mrf.mxu1 }
 0x1fe   :  { %v601_v41 = vpop.f32.mrf.mxu0  ;;  %v523_v44 = vmul.f32 %v514_v40, %v434_v35  ;;  %v526_v49 = vadd.f32 %v524_v42, %v441_v46 }
 0x1ff   :  { %v613_v43 = vadd.f32 %v611_v37, %v528_v36  ;;  %v610_v45 = vmul.f32 %v601_v41, %v434_v35 }
 0x200   :  { %v525_v47 = vadd.f32 %v523_v44, %v440_v38 }
 0x201   :  { %v612_v48 = vadd.f32 %v610_v45, %v527_v39  ;;  %636 = vrot.lane.b32.xlu1 %v613_v43, %s2098_s4  ;;  %632 = vrot.lane.b32.xlu0 %v613_v43, %s2099_s19 }
 0x202   :  { %1759 = vmatprep.subr.msk.mxu1 %vm662_vm1, %v613_v43  ;;  %1763 = vmatprep.mubr.msk.f32.mxu1 %vm662_vm1, %v525_v47 }
 0x203   :  { %1760 = vmatpush3.xpose.msk.msra.mxu1 %vm662_vm1, %v613_v43 }
 0x204   :  { %1761 = vmatprep.subr.msk.mxu1 %vm662_vm1, %v612_v48 }
 0x205   :  { %618 = vrot.lane.b32.xlu0 %v526_v49, %s2099_s19  ;;  %616 = vrot.lane.b32.xlu1 %v525_v47, %s2099_s19 }
 0x207   :  { %1762 = vmatpush3.xpose.msk.msra.mxu1 %vm662_vm1, %v612_v48 }
 0x209   :  { %630 = vrot.lane.b32.xlu0 %v612_v48, %s2099_s19  ;;  %634 = vrot.lane.b32.xlu1 %v612_v48, %s2098_s4 }
 0x20a   :  { %1764 = vmatmul.mubr.msk.f32.vlgmr.msra.gmra.mxu1 %vm662_vm1, %v526_v49 }
 0x20d   :  { %640 = vrot.lane.b32.xlu0 %v613_v43, %s2100_s10  ;;  %620 = vrot.lane.b32.xlu1 %v525_v47, %s2098_s4 }
 0x211   :  { %622 = vrot.lane.b32.xlu0 %v526_v49, %s2098_s4  ;;  %638 = vrot.lane.b32.xlu1 %v612_v48, %s2100_s10 }
 0x215   :  { %624 = vrot.lane.b32.xlu0 %v525_v47, %s2100_s10  ;;  %626 = vrot.lane.b32.xlu1 %v526_v49, %s2100_s10 }
 0x273   :  { %v637_v50 = vpop.permute.xlu1 %636  ;;  %v633_v51 = vpop.permute.xlu0 %632 }
 0x274   :  { %1766 = vmatprep.subr.msk.mxu0 %vm662_vm1, %v633_v51  ;;  %1773 = vmatprep.subr.msk.mxu1 %vm662_vm1, %v637_v50 }
 0x275   :  { %1767 = vmatpush3.xpose.msk.msra.mxu0 %vm662_vm1, %v633_v51  ;;  %1774 = vmatpush3.xpose.msk.msra.mxu1 %vm662_vm1, %v637_v50 }
 0x277   :  { %v619_v52 = vpop.permute.xlu0 %618  ;;  %v617_v53 = vpop.permute.xlu1 %616 }
 0x278   :  { %1770 = vmatprep.mubr.msk.f32.mxu0 %vm662_vm1, %v617_v53 }
 0x27b   :  { %v631_v55 = vpop.permute.xlu0 %630  ;;  %v635_v56 = vpop.permute.xlu1 %634 }
 0x27c   :  { %1768 = vmatprep.subr.msk.mxu0 %vm662_vm1, %v631_v55  ;;  %1775 = vmatprep.subr.msk.mxu1 %vm662_vm1, %v635_v56 }
 0x27d   :  { %1769 = vmatpush3.xpose.msk.msra.mxu0 %vm662_vm1, %v631_v55  ;;  %1776 = vmatpush3.xpose.msk.msra.mxu1 %vm662_vm1, %v635_v56 }
 0x27e   :  { %1787 = vmatprep.subr.mxu1 %v2272_v57 }
 0x27f   :  { %v641_v58 = vpop.permute.xlu0 %640  ;;  %v621_v59 = vpop.permute.xlu1 %620 }
 0x280   :  { %1771 = vmatmul.mubr.msk.f32.vlgmr.msra.gmra.mxu0 %vm662_vm1, %v619_v52  ;;  %1777 = vmatprep.mubr.msk.f32.mxu1 %vm662_vm1, %v621_v59 }
 0x281   :  { %1780 = vmatprep.subr.msk.mxu0 %vm662_vm1, %v641_v58 }
 0x282   :  { %1781 = vmatpush3.xpose.msk.msra.mxu0 %vm662_vm1, %v641_v58 }
 0x283   :  { %v623_v60 = vpop.permute.xlu0 %622  ;;  %v639_v61 = vpop.permute.xlu1 %638 }
 0x284   :  { %1778 = vmatmul.mubr.msk.f32.vlgmr.msra.gmra.mxu1 %vm662_vm1, %v623_v60  ;;  %1782 = vmatprep.subr.msk.mxu0 %vm662_vm1, %v639_v61 }
 0x285   :  { %1788 = vmatpush3.msra.mxu1 %v2272_v57 }
 0x286   :  { %1783 = vmatpush3.xpose.msk.msra.mxu0 %vm662_vm1, %v639_v61  ;;  %1789 = vmatprep.subr.mxu1 %v2284_v62 }
 0x287   :  { %1790 = vmatpush3.msra.mxu1 %v2284_v62  ;;  %v625_v63 = vpop.permute.xlu0 %624  ;;  %v627_v0 = vpop.permute.xlu1 %626 }
 0x288   :  { %1784 = vmatprep.mubr.msk.f32.mxu0 %vm662_vm1, %v625_v63 }
 0x289   :  { %1785 = vmatmul.mubr.msk.f32.vlgmr.msra.gmra.mxu0 %vm662_vm1, %v627_v0 }
 0x2ca   :  { %v1765_v1 = vpop.f32.mrf.mxu1 }
 0x2cb   :  { %v996_v3 = vmul.f32 0.35355338, %v1765_v1 }
 0x2cc   :  { %v737_v4 = vpop.f32.mrf.mxu1 }
 0x2cd   :  { %v995_v6 = vmul.f32 0.35355338, %v737_v4  ;;  %v1006_v7 = vadd.f32 %v1004_v2, %v996_v3 }
 0x2cf   :  { %v1017_v8 = vsel %vm1013_vm2, %v1006_v7, -inf  ;;  %v1005_v9 = vadd.f32 %v1003_v5, %v995_v6 }
 0x2d0   :  { %1018 = vmax.xlane.f32.xlu1 %v1017_v8 }
 0x2d1   :  { %v1014_v10 = vsel %vm1013_vm2, %v1005_v9, -inf }
 0x2d2   :  { %1015 = vmax.xlane.f32.xlu0 %v1014_v10 }
 0x340   :  { %v1772_v11 = vpop.f32.mrf.mxu0 }
 0x341   :  { %v998_v13 = vmul.f32 0.35355338, %v1772_v11 }
 0x342   :  { %v820_v12 = vpop.f32.mrf.mxu0 }
 0x343   :  { %v997_v14 = vmul.f32 0.35355338, %v820_v12  ;;  %v1008_v21 = vadd.f32 %v1004_v2, %v998_v13 }
 0x344   :  { %v1779_v15 = vpop.f32.mrf.mxu1 }
 0x345   :  { %v1007_v16 = vadd.f32 %v1003_v5, %v997_v14  ;;  %v1000_v18 = vmul.f32 0.35355338, %v1779_v15  ;;  %v1023_v26 = vsel %vm1013_vm2, %v1008_v21, -inf }
 0x346   :  { %v903_v17 = vpop.f32.mrf.mxu1 }
 0x347   :  { %v999_v19 = vmul.f32 0.35355338, %v903_v17  ;;  %v1020_v20 = vsel %vm1013_vm2, %v1007_v16, -inf  ;;  %v1010_v28 = vadd.f32 %v1004_v2, %v1000_v18 }
 0x348   :  { %1021 = vmax.xlane.f32.xlu0 %v1020_v20 }
 0x349   :  { %v1786_v22 = vpop.f32.mrf.mxu0  ;;  %v1009_v23 = vadd.f32 %v1003_v5, %v999_v19  ;;  %v1029_v31 = vsel %vm1013_vm2, %v1010_v28, -inf }
 0x34a   :  { %v1002_v24 = vmul.f32 0.35355338, %v1786_v22 }
 0x34b   :  { %v986_v25 = vpop.f32.mrf.mxu0  ;;  %v1026_v27 = vsel %vm1013_vm2, %v1009_v23, -inf }
 0x34c   :  { %v1001_v29 = vmul.f32 0.35355338, %v986_v25  ;;  %1024 = vmax.xlane.f32.xlu0 %v1023_v26  ;;  %1027 = vmax.xlane.f32.xlu1 %v1026_v27  ;;  %v1012_v32 = vadd.f32 %v1004_v2, %v1002_v24 }
 0x34e   :  { %v1011_v30 = vadd.f32 %v1003_v5, %v1001_v29  ;;  %v1035_v34 = vsel %vm1013_vm2, %v1012_v32, -inf }
 0x350   :  { %1030 = vmax.xlane.f32.xlu0 %v1029_v31  ;;  %v1032_v33 = vsel %vm1013_vm2, %v1011_v30, -inf }
 0x351   :  { %1033 = vmax.xlane.f32.xlu1 %v1032_v33 }
 0x354   :  { %1036 = vmax.xlane.f32.xlu0 %v1035_v34 }
 0x359   :  { %v1019_v35 = vpop.xlane.xlu1 %1018 }
 0x35a   :  { %v1039_v36 = vsub.f32 %v1006_v7, %v1019_v35 }
 0x35b   :  { %v1016_v37 = vpop.xlane.xlu0 %1015 }
 0x35c   :  { %v1048_v38 = vmul.f32 1.442695, %v1039_v36  ;;  %v1038_v39 = vsub.f32 %v1005_v9, %v1016_v37 }
 0x35e   :  { %1843 = vpow2.f32 %v1048_v38  ;;  %v1046_v40 = vmul.f32 1.442695, %v1038_v39 }
 0x360   :  { %1845 = vpow2.f32 %v1046_v40 }
 0x362   :  { %646 = vrot.lane.b32.xlu1 %v2272_v57, %s2099_s19 }
 0x366   :  { %652 = vrot.lane.b32.xlu1 %v2272_v57, %s2098_s4 }
 0x36a   :  { %644 = vrot.lane.b32.xlu0 %v2284_v62, %s2099_s19  ;;  %650 = vrot.lane.b32.xlu1 %v2284_v62, %s2098_s4 }
 0x36b   :  { %v2310_v41 = vpop.eup %1843 }
 0x36c   :  { %v1065_v42 = vsel %vm1013_vm2, %v2310_v41, 0.0 }
 0x36d   :  { %v2314_v43 = vpop.eup %1845 }
 0x36e   :  { %v1062_v44 = vsel %vm1013_vm2, %v2314_v43, 0.0 }
 0x389   :  { %1066 = vadd.xlane.f32.xlu0 %v1065_v42 }
 0x38e   :  { %1063 = vadd.xlane.f32.xlu1 %v1062_v44 }
 0x3d1   :  { %v1022_v45 = vpop.xlane.xlu0 %1021 }
 0x3d2   :  { %v1040_v46 = vsub.f32 %v1007_v16, %v1022_v45 }
 0x3d4   :  { %v1050_v47 = vmul.f32 1.442695, %v1040_v46 }
 0x3d5   :  { %v1025_v48 = vpop.xlane.xlu0 %1024  ;;  %v1028_v49 = vpop.xlane.xlu1 %1027 }
 0x3d6   :  { %1847 = vpow2.f32 %v1050_v47  ;;  %v1041_v50 = vsub.f32 %v1008_v21, %v1025_v48  ;;  %v1042_v51 = vsub.f32 %v1009_v23, %v1028_v49 }
 0x3d8   :  { %v1052_v52 = vmul.f32 1.442695, %v1041_v50  ;;  %v1054_v53 = vmul.f32 1.442695, %v1042_v51 }
 0x3d9   :  { %v1031_v54 = vpop.xlane.xlu0 %1030 }
 0x3da   :  { %1849 = vpow2.f32 %v1052_v52  ;;  %v1043_v55 = vsub.f32 %v1010_v28, %v1031_v54  ;;  %v1034_v56 = vpop.xlane.xlu1 %1033 }
 0x3db   :  { %1851 = vpow2.f32 %v1054_v53  ;;  %v1044_v58 = vsub.f32 %v1011_v30, %v1034_v56 }
 0x3dc   :  { %v1056_v59 = vmul.f32 1.442695, %v1043_v55 }
 0x3dd   :  { %v1058_v60 = vmul.f32 1.442695, %v1044_v58  ;;  %v1037_v61 = vpop.xlane.xlu0 %1036 }
 0x3de   :  { %1853 = vpow2.f32 %v1056_v59  ;;  %v1045_v63 = vsub.f32 %v1012_v32, %v1037_v61  ;;  %v647_v0 = vpop.permute.xlu1 %646 }
 0x3df   :  { %1855 = vpow2.f32 %v1058_v60  ;;  %1794 = vmatprep.subr.mxu1 %v647_v0 }
 0x3e0   :  { %v1060_v1 = vmul.f32 1.442695, %v1045_v63 }
 0x3e1   :  { %v645_v15 = vpop.permute.xlu0 %644 }
 0x3e2   :  { %1857 = vpow2.f32 %v1060_v1  ;;  %v653_v14 = vpop.permute.xlu1 %652 }
 0x3e3   :  { %v2318_v2 = vpop.eup %1847 }
 0x3e4   :  { %v1068_v3 = vsel %vm1013_vm2, %v2318_v2, 0.0 }
 0x3e5   :  { %1069 = vadd.xlane.f32.xlu1 %v1068_v3  ;;  %v1484_v3 = vld [vmem:[#allocation16 + $0x18] sm:$0xff] }
 0x3e6   :  { %v2346_v17 = vpop.permute.xlu1 %650  ;;  %1815 = vmatprep.subr.mxu0 %v1484_v3 }
 0x3e7   :  { %v2322_v4 = vpop.eup %1849  ;;  %1816 = vmatpush3.msra.mxu0 %v1484_v3 }
 0x3e8   :  { %v2324_v5 = vpop.eup %1851  ;;  %v1071_v6 = vsel %vm1013_vm2, %v2322_v4, 0.0 }
 0x3e9   :  { %1072 = vadd.xlane.f32.xlu0 %v1071_v6  ;;  %v1074_v7 = vsel %vm1013_vm2, %v2324_v5, 0.0  ;;  %v1482_v6 = vld [vmem:[#allocation16 + $0x8] sm:$0xff] }
 0x3ea   :  { %1075 = vadd.xlane.f32.xlu1 %v1074_v7 }
 0x3eb   :  { %v2330_v8 = vpop.eup %1853 }
 0x3ec   :  { %v2332_v9 = vpop.eup %1855  ;;  %v1077_v10 = vsel %vm1013_vm2, %v2330_v8, 0.0 }
 0x3ed   :  { %1078 = vadd.xlane.f32.xlu0 %v1077_v10  ;;  %v1080_v11 = vsel %vm1013_vm2, %v2332_v9, 0.0 }
 0x3ee   :  { %1081 = vadd.xlane.f32.xlu1 %v1080_v11 }
 0x3ef   :  { %v2338_v12 = vpop.eup %1857 }
 0x3f0   :  { %v1083_v13 = vsel %vm1013_vm2, %v2338_v12, 0.0 }
 0x3f1   :  { %1084 = vadd.xlane.f32.xlu0 %v1083_v13 }
 0x3ff   :  { %656 = vrot.lane.b32.xlu1 %v2284_v62, %s2100_s10 }
 0x407   :  { %658 = vrot.lane.b32.xlu0 %v2272_v57, %s2100_s10 }
 0x412   :  { %v1067_v16 = vpop.xlane.xlu0 %1066 }
 0x413   :  { %1859 = vrcp.f32 %v1067_v16 }
 0x417   :  { %v1064_v18 = vpop.xlane.xlu1 %1063 }
 0x418   :  { %1861 = vrcp.f32 %v1064_v18 }
 0x420   :  { %v1860_v19 = vpop.eup %1859 }
 0x421   :  { %v1095_v20 = vmul.f32 %v1860_v19, %v1067_v16 }
 0x423   :  { %v1103_v22 = vsub.f32 2.0, %v1095_v20 }
 0x425   :  { %v1862_v21 = vpop.eup %1861  ;;  %v1111_v25 = vmul.f32 %v1860_v19, %v1103_v22 }
 0x426   :  { %v1094_v23 = vmul.f32 %v1862_v21, %v1064_v18 }
 0x427   :  { %v1119_v57 = vmul.f32 %v2310_v41, %v1111_v25 }
 0x428   :  { %v1102_v24 = vsub.f32 2.0, %v1094_v23 }
 0x42a   :  { %v1110_v26 = vmul.f32 %v1862_v21, %v1102_v24 }
 0x42c   :  { %v1118_v62 = vmul.f32 %v2314_v43, %v1110_v26 }
 0x42e   :  { %1791 = vmatprep.mubr.msk.f32.mxu1 %vm1013_vm2, %v1118_v62  ;;  %v1633_v62 = vld [vmem:[%s2397_s12] ss:$0 sm:$0xff] }
 0x42f   :  { %1792 = vmatmul.mubr.msk.f32.vlgmr.msra.gmra.mxu1 %vm1013_vm2, %v1119_v57 }
 0x430   :  { %1795 = vmatpush3.msra.mxu1 %v647_v0 }
 0x431   :  { %1796 = vmatprep.subr.mxu1 %v645_v15 }
 0x432   :  { %1797 = vmatpush3.msra.mxu1 %v645_v15 }
 0x433   :  { %1801 = vmatprep.subr.mxu1 %v653_v14 }
 0x46e   :  { %v1070_v27 = vpop.xlane.xlu1 %1069 }
 0x46f   :  { %1863 = vrcp.f32 %v1070_v27 }
 0x472   :  { %v1073_v28 = vpop.xlane.xlu0 %1072 }
 0x473   :  { %1865 = vrcp.f32 %v1073_v28  ;;  %v1076_v29 = vpop.xlane.xlu1 %1075 }
 0x474   :  { %1867 = vrcp.f32 %v1076_v29 }
 0x476   :  { %v1079_v30 = vpop.xlane.xlu0 %1078 }
 0x477   :  { %1869 = vrcp.f32 %v1079_v30  ;;  %v1082_v31 = vpop.xlane.xlu1 %1081 }
 0x478   :  { %1871 = vrcp.f32 %v1082_v31 }
 0x47a   :  { %v1085_v32 = vpop.xlane.xlu0 %1084 }
 0x47b   :  { %1873 = vrcp.f32 %v1085_v32  ;;  %v657_v1 = vpop.permute.xlu1 %656 }
 0x47c   :  { %v1864_v33 = vpop.eup %1863 }
 0x47d   :  { %v1096_v34 = vmul.f32 %v1864_v33, %v1070_v27 }
 0x47e   :  { %v659_v63 = vpop.permute.xlu0 %658 }
 0x47f   :  { %v1104_v35 = vsub.f32 2.0, %v1096_v34 }
 0x480   :  { %v1866_v36 = vpop.eup %1865 }
 0x481   :  { %v1868_v37 = vpop.eup %1867  ;;  %v1112_v38 = vmul.f32 %v1864_v33, %v1104_v35  ;;  %v1097_v39 = vmul.f32 %v1866_v36, %v1073_v28 }
 0x482   :  { %v1098_v40 = vmul.f32 %v1868_v37, %v1076_v29 }
 0x483   :  { %v1120_v41 = vmul.f32 %v2318_v2, %v1112_v38  ;;  %v1105_v42 = vsub.f32 2.0, %v1097_v39 }
 0x484   :  { %v1870_v43 = vpop.eup %1869  ;;  %v1106_v44 = vsub.f32 2.0, %v1098_v40 }
 0x485   :  { %v1872_v45 = vpop.eup %1871  ;;  %v1113_v46 = vmul.f32 %v1866_v36, %v1105_v42  ;;  %v1099_v47 = vmul.f32 %v1870_v43, %v1079_v30  ;;  %1798 = vmatprep.mubr.msk.f32.mxu1 %vm1013_vm2, %v1120_v41 }
 0x486   :  { %v1114_v48 = vmul.f32 %v1868_v37, %v1106_v44  ;;  %v1100_v49 = vmul.f32 %v1872_v45, %v1082_v31 }
 0x487   :  { %v1121_v50 = vmul.f32 %v2322_v4, %v1113_v46  ;;  %v1107_v51 = vsub.f32 2.0, %v1099_v47 }
 0x488   :  { %v1874_v52 = vpop.eup %1873  ;;  %v1122_v53 = vmul.f32 %v2324_v5, %v1114_v48  ;;  %v1108_v54 = vsub.f32 2.0, %v1100_v49  ;;  %v1483_v5 = vld [vmem:[#allocation16 + $0x10] sm:$0xff] }
 0x489   :  { %v1115_v55 = vmul.f32 %v1870_v43, %v1107_v51  ;;  %v1101_v56 = vmul.f32 %v1874_v52, %v1085_v32  ;;  %1799 = vmatmul.mubr.msk.f32.vlgmr.msra.gmra.mxu1 %vm1013_vm2, %v1121_v50  ;;  %1817 = vmatprep.subr.mxu0 %v1483_v5 }
 0x48a   :  { %v1116_v58 = vmul.f32 %v1872_v45, %v1108_v54  ;;  %1802 = vmatpush3.msra.mxu1 %v653_v14  ;;  %1805 = vmatprep.mubr.msk.f32.mxu1 %vm1013_vm2, %v1122_v53 }
 0x48b   :  { %v1123_v59 = vmul.f32 %v2330_v8, %v1115_v55  ;;  %v1109_v60 = vsub.f32 2.0, %v1101_v56  ;;  %1803 = vmatprep.subr.mxu1 %v2346_v17  ;;  %1818 = vmatpush3.msra.mxu0 %v1483_v5  ;;  %v1481_v8 = vld [vmem:[#allocation16] sm:$0xff] }
 0x48c   :  { %v1124_v61 = vmul.f32 %v2332_v9, %v1116_v58  ;;  %1804 = vmatpush3.msra.mxu1 %v2346_v17  ;;  %1819 = vmatprep.subr.mxu0 %v1482_v6 }
 0x48d   :  { %v1117_v0 = vmul.f32 %v1874_v52, %v1109_v60  ;;  %1808 = vmatprep.subr.mxu1 %v659_v63  ;;  %1806 = vmatmul.mubr.msk.f32.vlgmr.msra.gmra.mxu1 %vm1013_vm2, %v1123_v59 }
 0x48e   :  { %1809 = vmatpush3.msra.mxu1 %v659_v63  ;;  %1812 = vmatprep.mubr.msk.f32.mxu1 %vm1013_vm2, %v1124_v61 }
 0x48f   :  { %v1125_v2 = vmul.f32 %v2338_v12, %v1117_v0  ;;  %1810 = vmatprep.subr.mxu1 %v657_v1  ;;  %1820 = vmatpush3.msra.mxu0 %v1482_v6 }
 0x490   :  { %1811 = vmatpush3.msra.mxu1 %v657_v1  ;;  %1821 = vmatprep.subr.mxu0 %v1481_v8 }
 0x491   :  { %1813 = vmatmul.mubr.msk.f32.vlgmr.msra.gmra.mxu1 %vm1013_vm2, %v1125_v2  ;;  %1822 = vmatpush3.msra.mxu0 %v1481_v8 }
 0x4ef   :  { %v1793_v4 = vpop.f32.mrf.mxu1 }
 0x4f1   :  { %v1198_v7 = vpop.f32.mrf.mxu1 }
 0x549   :  { %v1800_v9 = vpop.f32.mrf.mxu1 }
 0x54a   :  { %1454 = vrot.lane.b32.xlu1 %v1800_v9, %s2090_s14 }
 0x54b   :  { %v1279_v10 = vpop.f32.mrf.mxu1 }
 0x54c   :  { %1452 = vrot.lane.b32.xlu0 %v1279_v10, %s2090_s14 }
 0x54d   :  { %v1807_v11 = vpop.f32.mrf.mxu1 }
 0x54e   :  { %1462 = vrot.lane.b32.xlu1 %v1807_v11, %s2101_s6 }
 0x54f   :  { %v1360_v12 = vpop.f32.mrf.mxu1 }
 0x550   :  { %1460 = vrot.lane.b32.xlu0 %v1360_v12, %s2101_s6 }
 0x551   :  { %v1814_v13 = vpop.f32.mrf.mxu1 }
 0x552   :  { %1470 = vrot.lane.b32.xlu1 %v1814_v13, %s2102_s22 }
 0x553   :  { %v1441_v14 = vpop.f32.mrf.mxu1 }
 0x554   :  { %1468 = vrot.lane.b32.xlu0 %v1441_v14, %s2102_s22 }
 0x5bc   :  { %v1455_v15 = vpop.permute.xlu1 %1454 }
 0x5bd   :  { %v1475_v21 = vsel %vm662_vm1, %v1793_v4, %v1455_v15 }
 0x5be   :  { %v1453_v16 = vpop.permute.xlu0 %1452 }
 0x5bf   :  { %v1474_v19 = vsel %vm662_vm1, %v1198_v7, %v1453_v16 }
 0x5c0   :  { %v1463_v17 = vpop.permute.xlu1 %1462 }
 0x5c1   :  { %v1477_v24 = vsel %vm1013_vm2, %v1475_v21, %v1463_v17 }
 0x5c2   :  { %v1461_v18 = vpop.permute.xlu0 %1460 }
 0x5c3   :  { %v1476_v22 = vsel %vm1013_vm2, %v1474_v19, %v1461_v18 }
 0x5c4   :  { %v1471_v20 = vpop.permute.xlu1 %1470 }
 0x5c5   :  { %v1480_v26 = vsel %vm1478_vm3, %v1477_v24, %v1471_v20 }
 0x5c6   :  { %v1469_v23 = vpop.permute.xlu0 %1468 }
 0x5c7   :  { %v1479_v25 = vsel %vm1478_vm3, %v1476_v22, %v1469_v23 }
 0x5c8   :  { %1823 = vmatprep.mubr.msk.f32.mxu0 %vm178_vm0, %v1479_v25 }
 0x5c9   :  { %1824 = vmatmul.mubr.msk.f32.vlgmr.msra.gmra.mxu0 %vm178_vm0, %v1480_v26 }
 0x689   :  { %v1825_v57 = vpop.f32.mrf.mxu0 }
 0x68a   :  { %v1570_v27 = vadd.f32 %v1825_v57, %v1633_v62 }
 0x68b   :  { %v1564_v28 = vpop.f32.mrf.mxu0 }
 0x68c   :  { %1574 = vst.msk [vmem:[#allocation17 + $0x8] sm:$0xff] %vm178_vm0, %v1570_v27  ;;  %v1565_v29 = vadd.f32 %v1633_v62, %v1564_v28 }
 0x68e   :  { %1573 = vst.msk [vmem:[#allocation17] sm:$0xff] %vm178_vm0, %v1565_v29 }
 0x68f   :  { %2066 = shalt.err (!%p2063_p7)
}
 0x690   :  { %1586 = dma.vmem_to_hbm [thread:$0]  %s1581_s1, 256, %s2398_s13, [#allocation4], %s2089_s30, %s2089_s30, %s2090_s14  }
 0x691   :  { %2085 = dma.done.wait [#allocation4], 256  }
 0x692   :  { %2086 = vsyncadd [#allocation4], 4294967040 }
 0x693   :  { %1590 = vsyncpa [#allocation3], 1 }
 0x694   :  { %1591 = vsyncpa [#allocation6], 1 }
 0x695   :  { %1592 = vsyncpa [#allocation9], 1 }
 0x696   :  { %1593 = vsyncpa [#allocation12], 1 }
 0x697   :  { %1594 = vsyncpa [#allocation15], 1 }
 0x698   :  { %1595 = vsyncpa [#allocation4], 1 }

</bundles_post_ra>
